<compile_context>
chip_gen: v7x
topology: tpu7x:2x2x1
jax: 0.10.0
libtpu: 0.0.40
codegen_flags: <defaults>
</compile_context>

<pallas_src>
import jax
import jax.numpy as jnp
from jax.experimental import pallas as pl
from jax.experimental.pallas import tpu as pltpu

LANE = 128
SUBLANE = 8


def _round_up(x, m):
    return (x + m - 1) // m * m


def _lane_tile(n, cap=512):
    """Largest multiple of 128 that divides n (n % 128 == 0) and is <= cap."""
    best = LANE
    t = LANE
    while t <= min(n, cap):
        if n % t == 0:
            best = t
        t += LANE
    return best


def _vmem_limit(block_elems):
    """Generous scoped-VMEM budget from the per-step block element count."""
    est = 4 * block_elems                      # f32 upper bound per buffer set
    return int(min(max(2 * est + (8 << 20), 32 << 20), 64 << 20))


# --------------------------------------------------------------------------
# Kernels
# --------------------------------------------------------------------------
def _proj_kernel(x_ref, w_ref, b_ref, o_ref):
    """o = x @ w + b   (batched input/attention projection, bias pre-summed)."""
    acc = jnp.dot(x_ref[...].astype(w_ref.dtype), w_ref[...],
                  preferred_element_type=jnp.float32)
    o_ref[...] = (acc + b_ref[...]).astype(o_ref.dtype)


def _outgate_kernel(s_ref, w_ref, p_ref, o_ref):
    """o = relu(s @ w + p)   (output-gate biases already folded into p)."""
    acc = jnp.dot(s_ref[...].astype(w_ref.dtype), w_ref[...],
                  preferred_element_type=jnp.float32) + p_ref[...]
    o_ref[...] = jnp.maximum(acc, 0.0).astype(o_ref.dtype)


def _gru_recurrent_kernel(p_ref, h0_ref, wh_ref, u_ref, s_ref, h_scr):
    """Tt blocked timesteps of the attention-GRU recurrence.

    grid = (batch_tiles, T//Tt).  Time is the innermost ("arbitrary") axis, so
    h_scr carries the hidden state across time blocks of one batch tile and is
    re-initialized from h0 whenever the batch tile changes (time index == 0).
    """
    tb = pl.program_id(1)
    Tt = p_ref.shape[0]
    Hp = h0_ref.shape[-1]

    @pl.when(tb == 0)
    def _():
        h_scr[...] = h0_ref[...]

    h = h_scr[...]                                       # (Bt, Hp) f32
    for i in range(Tt):                                  # fully unrolled
        p = p_ref[i]                                     # (Bt, 4*Hp): [z|r|s~|o]
        zr = jnp.dot(h, wh_ref[...], preferred_element_type=jnp.float32)
        z = jax.nn.sigmoid(p[:, 0:Hp] + zr[:, 0:Hp])
        r = jax.nn.sigmoid(p[:, Hp:2 * Hp] + zr[:, Hp:2 * Hp])
        s_til = jnp.tanh(p[:, 2 * Hp:3 * Hp]
                         + jnp.dot(r * h, u_ref[...],
                                   preferred_element_type=jnp.float32))
        h = (1.0 - z) * h + z * s_til
        s_ref[i] = h.astype(s_ref.dtype)
    h_scr[...] = h


# --------------------------------------------------------------------------
# Parameter packing (PyTorch Linear weights, pre-transposed to (in, out))
# --------------------------------------------------------------------------
def pack_params(raw, emb_dim, hidden_size, combined, weight_dtype=jnp.float32):
    """Fuse the 12 Linear layers into (W_xa, b_xa, W_h, U, U_o), lane-padded."""
    E, H, C = emb_dim, hidden_size, combined
    Ep, Hp, Cp = _round_up(E, LANE), _round_up(H, LANE), _round_up(C, LANE)
    Kin = Ep + Cp

    def put(buf, w, r0, c0, dt):
        return buf.at[r0:r0 + w.shape[0], c0:c0 + w.shape[1]].set(w.astype(dt))

    # Non-recurrent projection: rows = [x | a], cols = [z | r | s~ | o].
    w_xa = jnp.zeros((Kin, 4 * Hp), weight_dtype)
    w_xa = put(w_xa, raw["w_z_w"], 0, 0, weight_dtype)
    w_xa = put(w_xa, raw["w_r_w"], 0, Hp, weight_dtype)
    w_xa = put(w_xa, raw["w_w"], 0, 2 * Hp, weight_dtype)
    w_xa = put(w_xa, raw["v_o_w"], 0, 3 * Hp, weight_dtype)
    w_xa = put(w_xa, raw["c_z_w"], Ep, 0, weight_dtype)
    w_xa = put(w_xa, raw["c_r_w"], Ep, Hp, weight_dtype)
    w_xa = put(w_xa, raw["c_w"], Ep, 2 * Hp, weight_dtype)
    w_xa = put(w_xa, raw["c_o_w"], Ep, 3 * Hp, weight_dtype)

    # All 12 biases folded into the 4 gate columns.
    b_xa = jnp.zeros((1, 4 * Hp), jnp.float32)

    def addb(buf, b, c0):
        return buf.at[0, c0:c0 + b.shape[0]].add(b.astype(jnp.float32))

    for nm in ("w_z", "u_z", "c_z"):
        b_xa = addb(b_xa, raw[nm + "_b"], 0)
    for nm in ("w_r", "u_r", "c_r"):
        b_xa = addb(b_xa, raw[nm + "_b"], Hp)
    for nm in ("w", "u", "c"):
        b_xa = addb(b_xa, raw[nm + "_b"], 2 * Hp)
    for nm in ("v_o", "c_o", "u_o"):
        b_xa = addb(b_xa, raw[nm + "_b"], 3 * Hp)

    # Recurrent weights stay f32 (bf16 rounding would compound over T).
    w_h = jnp.zeros((Hp, 2 * Hp), jnp.float32)          # [u_z | u_r]
    w_h = put(w_h, raw["u_z_w"], 0, 0, jnp.float32)
    w_h = put(w_h, raw["u_r_w"], 0, Hp, jnp.float32)
    u_rec = jnp.zeros((Hp, Hp), jnp.float32)            # u
    u_rec = put(u_rec, raw["u_w"], 0, 0, jnp.float32)

    # Deferred output-gate weight (non-recurrent -> may be bf16).
    u_o = jnp.zeros((Hp, Hp), weight_dtype)
    u_o = put(u_o, raw["u_o_w"], 0, 0, weight_dtype)

    return dict(w_xa=w_xa, b_xa=b_xa, w_h=w_h, u_rec=u_rec, u_o=u_o,
                E=E, H=H, C=C, Ep=Ep, Hp=Hp, Cp=Cp)


# --------------------------------------------------------------------------
# Wrappers
# --------------------------------------------------------------------------
def attention_gru_sequence(x_seq, h0, a_seq, packed, *, time_block=8,
                           batch_tile=None):
    """Run the attention-GRU cell over a whole sequence.

    x_seq: (T, B, E)   embedded previous words
    h0:    (B, H)      initial hidden state
    a_seq: (T, B, C)   attended states, C = 2H (bidirectional) or H
    Returns (s_seq, t_seq), each (T, B, H).

    batch_tile: on v7x pass a multiple of 8 dividing round_up(B, 8) that gives
    >= 2 batch tiles so the "parallel" axis shards across both TensorCores.
    """
    T, B, E = x_seq.shape
    H = h0.shape[-1]
    C = a_seq.shape[-1]
    Ep, Hp, Cp = packed["Ep"], packed["Hp"], packed["Cp"]
    Kin = Ep + Cp

    Bp = _round_up(B, SUBLANE)
    bt = Bp if batch_tile is None else batch_tile
    assert bt % SUBLANE == 0 and Bp % bt == 0, "batch_tile must tile padded B"
    nb = Bp // bt

    Tt = min(time_block, T)            # timesteps blocked per grid step
    Tp = _round_up(T, Tt)
    ntb = Tp // Tt

    # TODO(synk): fuse this padding + [x|a] concatenation into the producer of
    # x_seq / a_seq to avoid re-materializing padded HBM copies on every call.
    xa = jnp.zeros((Tp, Bp, Kin), jnp.float32)
    xa = xa.at[:T, :B, :E].set(x_seq.astype(jnp.float32))
    xa = xa.at[:T, :B, Ep:Ep + C].set(a_seq.astype(jnp.float32))
    h0p = jnp.zeros((Bp, Hp), jnp.float32).at[:B, :H].set(h0.astype(jnp.float32))

    M = Tp * Bp
    row_tile = Tt * Bp
    while row_tile > 1024 and row_tile % 16 == 0:
        row_tile //= 2                 # keep blocks VMEM-friendly; still tiles M
    col_tile = _lane_tile(Hp)

    w_xa, b_xa = packed["w_xa"], packed["b_xa"]
    w_h, u_rec, u_o = packed["w_h"], packed["u_rec"], packed["u_o"]

    # ---- Phase 1: batched, h-independent projection (fills the MXU) -------
    p_all = pl.pallas_call(
        _proj_kernel,
        out_shape=jax.ShapeDtypeStruct((M, 4 * Hp), jnp.float32),
        grid_spec=pltpu.PrefetchScalarGridSpec(
            num_scalar_prefetch=0,
            grid=(M // row_tile, 4 * Hp // col_tile),
            in_specs=[
                pl.BlockSpec((row_tile, Kin), lambda i, j: (i, 0)),
                pl.BlockSpec((Kin, col_tile), lambda i, j: (0, j)),
                pl.BlockSpec((1, col_tile), lambda i, j: (0, j)),
            ],
            out_specs=pl.BlockSpec((row_tile, col_tile), lambda i, j: (i, j)),
        ),
        compiler_params=pltpu.CompilerParams(
            dimension_semantics=("parallel", "parallel"),
            vmem_limit_bytes=_vmem_limit(
                row_tile * Kin + Kin * col_tile + col_tile
                + row_tile * col_tile),
        ),
    )(xa.reshape(M, Kin), w_xa, b_xa)
    p_seq = p_all.reshape(Tp, Bp, 4 * Hp)

    # ---- Phase 2: serial recurrence (only h-dependent work) ---------------
    s_seq_p = pl.pallas_call(
        _gru_recurrent_kernel,
        out_shape=jax.ShapeDtypeStruct((Tp, Bp, Hp), jnp.float32),
        grid_spec=pltpu.PrefetchScalarGridSpec(
            num_scalar_prefetch=0,
            grid=(nb, ntb),
            in_specs=[
                pl.BlockSpec((Tt, bt, 4 * Hp), lambda b, t: (t, b, 0)),  # P
                pl.BlockSpec((bt, Hp), lambda b, t: (b, 0)),             # h0
                pl.BlockSpec((Hp, 2 * Hp), lambda b, t: (0, 0)),         # [u_z|u_r]
                pl.BlockSpec((Hp, Hp), lambda b, t: (0, 0)),             # u
            ],
            out_specs=pl.BlockSpec((Tt, bt, Hp), lambda b, t: (t, b, 0)),
            scratch_shapes=[pltpu.VMEM((bt, Hp), jnp.float32)],
        ),
        compiler_params=pltpu.CompilerParams(
            dimension_semantics=("parallel", "arbitrary"),
            vmem_limit_bytes=_vmem_limit(
                Tt * bt * 4 * Hp + 2 * bt * Hp + Hp * 2 * Hp + Hp * Hp
                + Tt * bt * Hp),
        ),
    )(p_seq, h0p, w_h, u_rec)

    # ---- Phase 3: deferred output gate, batched over the whole sequence ---
    col_off = 3 * (Hp // col_tile)     # block-column offset of the "o" slice
    t_all = pl.pallas_call(
        _outgate_kernel,
        out_shape=jax.ShapeDtypeStruct((M, Hp), jnp.float32),
        grid_spec=pltpu.PrefetchScalarGridSpec(
            num_scalar_prefetch=0,
            grid=(M // row_tile, Hp // col_tile),
            in_specs=[
                pl.BlockSpec((row_tile, Hp), lambda i, j: (i, 0)),        # S
                pl.BlockSpec((Hp, col_tile), lambda i, j: (0, j)),        # U_o
                pl.BlockSpec((row_tile, col_tile),
                             lambda i, j: (i, col_off + j)),              # P_o
            ],
            out_specs=pl.BlockSpec((row_tile, col_tile), lambda i, j: (i, j)),
        ),
        compiler_params=pltpu.CompilerParams(
            dimension_semantics=("parallel", "parallel"),
            vmem_limit_bytes=_vmem_limit(
                row_tile * Hp + Hp * col_tile + 2 * row_tile * col_tile),
        ),
    )(s_seq_p.reshape(M, Hp), u_o, p_all)
    t_seq_p = t_all.reshape(Tp, Bp, Hp)

    return s_seq_p[:T, :B, :H], t_seq_p[:T, :B, :H]


def attention_gru_cell(in_word, last_hid_state, attended_state, packed):
    """Single-step forward, matching AttentionGRUCell.forward (T = 1)."""
    s_seq, t_seq = attention_gru_sequence(in_word[None], last_hid_state,
                                          attended_state[None], packed,
                                          time_block=1)
    return s_seq[0], t_seq[0]


# --------------------------------------------------------------------------
# Synthetic parameters + pure-JAX reference
# --------------------------------------------------------------------------
def init_params(key, emb_dim, hidden_size, bidirectional_encoder=True):
    """Synthetic PyTorch-Linear-style params, already transposed to (in, out)."""
    combined = hidden_size * 2 if bidirectional_encoder else hidden_size
    names_shapes = [
        ("w_z", (emb_dim, hidden_size)), ("w_r", (emb_dim, hidden_size)),
        ("w", (emb_dim, hidden_size)), ("v_o", (emb_dim, hidden_size)),
        ("c_z", (combined, hidden_size)), ("c_r", (combined, hidden_size)),
        ("c", (combined, hidden_size)), ("c_o", (combined, hidden_size)),
        ("u_z", (hidden_size, hidden_size)), ("u_r", (hidden_size, hidden_size)),
        ("u", (hidden_size, hidden_size)), ("u_o", (hidden_size, hidden_size)),
    ]
    keys = jax.random.split(key, 2 * len(names_shapes))
    raw = {}
    for i, (name, shp) in enumerate(names_shapes):
        kw, kb = keys[2 * i], keys[2 * i + 1]
        bound = 1.0 / jnp.sqrt(jnp.float32(shp[0]))
        raw[name + "_w"] = jax.random.uniform(kw, shp, jnp.float32, -bound, bound)
        raw[name + "_b"] = jax.random.uniform(kb, (shp[1],), jnp.float32,
                                              -bound, bound)
    return raw, combined


def reference_cell(x, h, a, raw):
    def lin(v, name):
        return v @ raw[name + "_w"] + raw[name + "_b"]
    z = jax.nn.sigmoid(lin(x, "w_z") + lin(h, "u_z") + lin(a, "c_z"))
    r = jax.nn.sigmoid(lin(x, "w_r") + lin(h, "u_r") + lin(a, "c_r"))
    s_tilda = jnp.tanh(lin(x, "w") + lin(r * h, "u") + lin(a, "c"))
    s = (1.0 - z) * h + z * s_tilda
    t = jax.nn.relu(lin(s, "u_o") + lin(x, "v_o") + lin(a, "c_o"))
    return s, t


def check_sequence(x_seq, h0, a_seq, raw, s_seq, t_seq, atol, rtol):
    h_ref = h0
    for step in range(x_seq.shape[0]):
        s_r, t_r = reference_cell(x_seq[step], h_ref, a_seq[step], raw)
        assert jnp.allclose(s_seq[step], s_r, atol=atol, rtol=rtol)
        assert jnp.allclose(t_seq[step], t_r, atol=atol, rtol=rtol)
        h_ref = s_r


# --------------------------------------------------------------------------
# Demo / verification
# --------------------------------------------------------------------------
if __name__ == "__main__":
    key = jax.random.PRNGKey(0)
    k_p, k_x, k_h, k_a, k_xs, k_as, k_h2, k_x2, k_a2 = jax.random.split(key, 9)

    B, E, H, T = 8, 32, 32, 6        # batch, emb_dim, hidden_size, seq_len
    raw, C = init_params(k_p, E, H, bidirectional_encoder=True)   # C = 2H

    packed_f32 = pack_params(raw, E, H, C, weight_dtype=jnp.float32)

    in_word = jax.random.normal(k_x, (B, E), jnp.float32)
    last_hid = jax.random.normal(k_h, (B, H), jnp.float32)
    attended = jax.random.normal(k_a, (B, C), jnp.float32)

    # --- 1) single-cell forward (exact module semantics, T = 1) ------------
    s, t = attention_gru_cell(in_word, last_hid, attended, packed_f32)
    jax.block_until_ready((s, t))
    s_ref, t_ref = reference_cell(in_word, last_hid, attended, raw)
    assert s.shape == (B, H) and t.shape == (B, H)
    assert jnp.allclose(s, s_ref, atol=1e-5, rtol=1e-5)
    assert jnp.allclose(t, t_ref, atol=1e-5, rtol=1e-5)

    # --- 2) sequence forward: hoisted projections + time-blocked recurrence
    x_seq = jax.random.normal(k_xs, (T, B, E), jnp.float32)
    a_seq = jax.random.normal(k_as, (T, B, C), jnp.float32)
    s_seq, t_seq = attention_gru_sequence(x_seq, last_hid, a_seq, packed_f32)
    jax.block_until_ready((s_seq, t_seq))
    check_sequence(x_seq, last_hid, a_seq, raw, s_seq, t_seq, 1e-4, 1e-4)

    # --- 3) multi batch-tile (v7x two-TC path) + multiple/padded time blocks
    B2, T2 = 16, 10
    x_seq2 = jax.random.normal(k_x2, (T2, B2, E), jnp.float32)
    a_seq2 = jax.random.normal(k_a2, (T2, B2, C), jnp.float32)
    h0_2 = jax.random.normal(k_h2, (B2, H), jnp.float32)
    s2, t2 = attention_gru_sequence(x_seq2, h0_2, a_seq2, packed_f32,
                                    time_block=4, batch_tile=8)
    jax.block_until_ready((s2, t2))
    check_sequence(x_seq2, h0_2, a_seq2, raw, s2, t2, 1e-4, 1e-4)

    # --- 4) bf16 non-recurrent weights (MXU-native); recurrence stays f32 --
    packed_bf16 = pack_params(raw, E, H, C, weight_dtype=jnp.bfloat16)
    s_b, t_b = attention_gru_cell(in_word, last_hid, attended, packed_bf16)
    jax.block_until_ready((s_b, t_b))
    assert jnp.allclose(s_b, s_ref, atol=5e-2, rtol=5e-2)
    assert jnp.allclose(t_b, t_ref, atol=5e-2, rtol=5e-2)

    print("KERNEL_OK")
</pallas_src>

<mosaic_0001>
module attributes {stable_mosaic.version = 11 : i64} {
  func.func @_proj_kernel(%arg0: i32, %arg1: i32, %arg2: memref<8x256xf32, #tpu.memory_space<vmem>>, %arg3: memref<256x128xf32, #tpu.memory_space<vmem>>, %arg4: memref<1x128xf32, #tpu.memory_space<vmem>>, %arg5: memref<8x128xf32, #tpu.memory_space<vmem>>) attributes {dimension_semantics = [#tpu.dimension_semantics<parallel>, #tpu.dimension_semantics<parallel>], iteration_bounds = array<i64: 1, 4>, scalar_prefetch = 0 : i64, scratch_operands = 0 : i64, tpu.core_type = #tpu.core_type<tc>, window_params = [{transform_indices = @transform_0, window_bounds = array<i64: 8, 256>}, {transform_indices = @transform_1, window_bounds = array<i64: 256, 128>}, {transform_indices = @transform_2, window_bounds = array<i64: 1, 128>}, {transform_indices = @transform_3, window_bounds = array<i64: 8, 128>}]} {
    %c0 = arith.constant 0 : index
    %c0_0 = arith.constant 0 : index
    %0 = vector.load %arg2[%c0, %c0_0] : memref<8x256xf32, #tpu.memory_space<vmem>>, vector<8x256xf32>
    %c0_1 = arith.constant 0 : index
    %c0_2 = arith.constant 0 : index
    %1 = vector.load %arg3[%c0_1, %c0_2] : memref<256x128xf32, #tpu.memory_space<vmem>>, vector<256x128xf32>
    %cst = arith.constant dense<0.000000e+00> : vector<8x128xf32>
    %2 = tpu.matmul %0, %1, %cst {dimension_numbers = #tpu.dot_dimension_numbers<[1], [0], [0], [1], [0, 0, 1, 1], [], []>} : vector<8x256xf32>, vector<256x128xf32>, vector<8x128xf32> -> vector<8x128xf32>
    %c0_3 = arith.constant 0 : index
    %c0_4 = arith.constant 0 : index
    %3 = vector.load %arg4[%c0_3, %c0_4] : memref<1x128xf32, #tpu.memory_space<vmem>>, vector<1x128xf32>
    %4 = vector.broadcast %3 : vector<1x128xf32> to vector<8x128xf32>
    %5 = arith.addf %2, %4 : vector<8x128xf32>
    %c0_5 = arith.constant 0 : index
    %c0_6 = arith.constant 0 : index
    %6 = vector.load %arg5[%c0_5, %c0_6] : memref<8x128xf32, #tpu.memory_space<vmem>>, vector<8x128xf32>
    tpu.vector_store %arg5[%c0_5, %c0_6], %5 {strides = array<i32>} : memref<8x128xf32, #tpu.memory_space<vmem>>, vector<8x128xf32>,
    return
  }
  func.func @transform_0(%arg0: i32, %arg1: i32) -> (i32, i32) {
    %c0_i32 = arith.constant 0 : i32
    %c0_i32_0 = arith.constant 0 : i32
    return %arg0, %c0_i32 : i32, i32
  }
  func.func @transform_1(%arg0: i32, %arg1: i32) -> (i32, i32) {
    %c0_i32 = arith.constant 0 : i32
    %c0_i32_0 = arith.constant 0 : i32
    return %c0_i32, %arg1 : i32, i32
  }
  func.func @transform_2(%arg0: i32, %arg1: i32) -> (i32, i32) {
    %c0_i32 = arith.constant 0 : i32
    %c0_i32_0 = arith.constant 0 : i32
    return %c0_i32, %arg1 : i32, i32
  }
  func.func @transform_3(%arg0: i32, %arg1: i32) -> (i32, i32) {
    %c0_i32 = arith.constant 0 : i32
    return %arg0, %arg1 : i32, i32
  }
}

</mosaic_0001>

<bundles_post_ra>
// kernel: tpu_custom_call.1
= control target key start
LH: loop header
LB: loop body
LE: loop exit
PB: predicated region body
PF: predicated region fallthrough
CT: control target
= control target key end

     0   :  { %8 = vsyncpa [#allocation3], 0  ;;  %s1056_s0 = inlined_call_operand.hbm [shape: f32[8,256], index: 0, kind: input, shape index: {}]   ;;  %s1057_s1 = inlined_call_operand.hbm [shape: f32[256,512], index: 1, kind: input, shape index: {}]   ;;  %s1058_s2 = inlined_call_operand.vmem [shape: f32[1,512], index: 2, kind: input, shape index: {}]   ;;  %s1059_s3 = inlined_call_operand.hbm [shape: f32[8,512], index: 3, kind: output, shape index: {}]  }
   0x1   :  { %9 = vsyncpa [#allocation6], 0 }
   0x2   :  { %11 = vsyncpa [#allocation6 + $0x1], 0 }
   0x3   :  { %12 = vsyncpa [#allocation4], 0 }
   0x4   :  { %14 = vsyncpa [#allocation4 + $0x1], 0  ;;  %s799_s12 = smov 0   ;;  %s801_s13 = smov 0  }
   0x5   :  { %s803_s14 = smov 0   ;;  %s805_s15 = smov 0  }
   0x6   :  { %s807_s16 = smov 0   ;;  %s809_s17 = smov 0  }
   0x7 LB: > { %s468_s18 = sadd.s32 4294967295, %s771_s17   ;;  %s469_s19 = sadd.s32 4294967294, %s771_s17   ;;  %s771_s17 = sphi %s809_s17, %s20_s17   ;;  %s767_s16 = sphi %s807_s16, %s1086_s16   ;;  %s763_s15 = sphi %s805_s15, %s1085_s15   ;;  %s759_s14 = sphi %s803_s14, %s1084_s14   ;;  %s755_s13 = sphi %s801_s13, %s1083_s13   ;;  %s751_s12 = sphi %s799_s12, %s1082_s12  }
   0x8   : > { %s65_s20 = sadd.s32 1, %s759_s14  ;;  %p72_p0 = scmp.ne.s32.totalorder %s759_s14, %s755_s13 }
   0x9   : > { %p73_p1 = scmp.eq.s32.totalorder %s771_s17, 0  ;;  %p78_p2 = scmp.ne.s32.totalorder %s755_s13, %s751_s12 }
   0xa   : > { %p837_p3 = scmp.eq.s32.totalorder %s468_s18, 0  ;;  %p130_p4 = scmp.eq.s32.totalorder %s468_s18, 3 }
   0xb   : > { %p841_p5 = por %p73_p1, %p72_p0  ;;  %p136_p6 = scmp.eq.s32.totalorder %s469_s19, 3 }
   0xc   : > { %s1066_s21 = scalar_select %p837_p3, 1, 0 }
   0xd   : > { %p847_p7 = por %p837_p3, %p78_p2  ;;  %p851_p8 = por %p130_p4, %p72_p0 }
   0xe   : > { %p855_p9 = por %p136_p6, %p78_p2  ;;  %p470_p10 = scmp.ge.s32.totalorder %s771_s17, 1 }
   0xf   : > { %s1068_s23 = scalar_select %p847_p7, 1, 0 }
  0x10   : > { %s1069_s24 = scalar_select %p851_p8, 1, 0 }
  0x11   : > { %s1070_s25 = scalar_select %p855_p9, 1, 0 }
  0x12   : > { %p143_p11 = scmp.lt.s32.totalorder %s771_s17, 5  ;;  %s773_s27 = smov [#allocation2]  }
  0x13   : > { %s159_s28 = sshll.u32 %s773_s27, 4  ;;  %p572_p13 = scmp.lt.s32.totalorder %s771_s17, 4  ;;  %s160_s28 = int_to_ptr.vmem [resolvable:$true] %s159_s28 }
  0x14   : > { %p861_p12 = pnand %p470_p10, %p143_p11  ;;  %s29_s4 = sadd.s32 1, %s767_s16 }
  0x15   : > { %p870_p1 = pnand %p572_p13, %p841_p5  ;;  %p881_p4 = scmp.ge.s32.totalorder %s29_s4, 4 }
  0x16   : > { %s1071_s26 = scalar_select %p861_p12, 1, 0 }
  0x17   : > { %p559_p0 = pneg %p861_p12  ;;  %s170_s6 = sand.u32 1, %s759_s14  }
  0x18   : > { %s1072_s29 = scalar_select %p870_p1, 1, 0 }
  0x19   : > { %p876_p2 = pnand %p559_p0, %p837_p3  ;;  %s627_s9 = scalar_lea.hbm %s1056_s0, 256 }
  0x1a   : > { %s1074_s5 = scalar_select %p881_p4, 1, 0 }
  0x1b   : > { %p628_p5 = scmp.ne.s32.totalorder %s1056_s0, %s627_s9  ;;  %p629_p6 = pneg %p876_p2 }
  0x1c   : > { %p634_p13 = scmp.lt.u32.totalorder %s627_s9, %s1056_s0 }
  0x1d   : > { %p630_p10 = pnand %p629_p6, %p628_p5 }
  0x1f   : > { %p631_p11 = pneg %p630_p10 }
  0x21   : > { %p636_p0 = pnand %p634_p13, %p631_p11 }
  0x23   : > { %639 = shalt.err (!%p636_p0)
}
  0x24   : > { %s640_s22 = scalar_lea.vmem %s160_s28, 256  ;;  %p648_p3 = scmp.lt.s32.totalorder %s160_s28, %s160_s28 }
  0x25   : > { %p641_p9 = scmp.ne.s32.totalorder %s160_s28, %s640_s22  ;;  %p649_p12 = scmp.lt.s32.totalorder %s640_s22, %s640_s22 }
  0x27   : > { %p643_p8 = pnand %p641_p9, %p629_p6  ;;  %p650_p1 = por %p649_p12, %p648_p3 }
  0x29   : > { %p644_p7 = pneg %p643_p8 }
  0x2b   : > { %p651_p4 = pnand %p650_p1, %p644_p7 }
  0x2d   : > { %654 = shalt.err (!%p651_p4)
}
  0x2e   : > { %562 = dma.hbm_to_vmem [thread:$0]  (!%p876_p2), %s1056_s0, 256, %s160_s28, [#allocation3]  }
  0x2f   : > { %p1075_p9 = scmp.ne.s32.totalorder %s1074_s5, 0  ;;  %s473_s8 = sshll.u32 %s170_s6, 8 }
  0x30   : > { %s474_s10 = sshll.u32 %s767_s16, 7  ;;  %s174_s19 = scalar_lea.vmem [#allocation5], %s473_s8 }
  0x31   : > { %s1088_s4 = smov (%p1075_p9, %s29_s4), 0  ;;  %s912_s18 = scalar_lea.hbm %s1057_s1, %s474_s10 }
  0x32   : > { %s62_s9 = ssub.s32 %s767_s16, %s1088_s4  ;;  %s180_s22 = sshll.u32 %s174_s19, 4  ;;  %s919_s22 = int_to_ptr.vmem [resolvable:$true] %s180_s22 }
  0x33   : > { %p63_p3 = scmp.eq.s32.totalorder %s62_s9, 0  ;;  %s921_s5 = scalar_lea.sflag [#allocation6], %s170_s6 }
  0x34   : > { %s655_s27 = scalar_lea.hbm %s912_s18, 4096  ;;  %p1076_p8 = scmp.ne.s32.totalorder %s1072_s29, 0 }
  0x35   : > { %s917_s28 = scalar_select %p63_p3, %s759_s14, %s65_s20  }
  0x36   : > { %p656_p7 = scmp.ne.s32.totalorder %s912_s18, %s655_s27  ;;  %p657_p12 = pneg %p1076_p8 }
  0x37   : > { %s660_s8 = scalar_lea.hbm %s1057_s1, 16384  ;;  %p661_p4 = scmp.lt.u32.totalorder %s912_s18, %s1057_s1 }
  0x38   : > { %p658_p1 = pnand %p657_p12, %p656_p7  ;;  %p662_p5 = scmp.lt.u32.totalorder %s660_s8, %s655_s27 }
  0x39   : > { %p664_p10 = scmp.lt.u32.totalorder %s655_s27, %s912_s18 }
  0x3a   : > { %p659_p2 = pneg %p658_p1  ;;  %p663_p6 = por %p662_p5, %p661_p4 }
  0x3c   : > { %p665_p11 = por %p664_p10, %p663_p6 }
  0x3e   : > { %p666_p13 = pnand %p665_p11, %p659_p2 }
  0x40   : > { %669 = shalt.err (!%p666_p13)
}
  0x41   : > { %s670_s20 = scalar_lea.vmem %s919_s22, 4096  ;;  %s774_s6 = smov [#allocation5]  }
  0x42   : > { %p671_p0 = scmp.ne.s32.totalorder %s919_s22, %s670_s20  ;;  %s675_s11 = sshll.u32 %s774_s6, 4  ;;  %s676_s11 = int_to_ptr.vmem [resolvable:$false] %s675_s11 }
  0x43   : > { %s677_s19 = scalar_lea.vmem %s676_s11, 8192  ;;  %p678_p7 = scmp.lt.s32.totalorder %s919_s22, %s676_s11 }
  0x44   : > { %p673_p9 = pnand %p671_p0, %p657_p12  ;;  %p679_p1 = scmp.lt.s32.totalorder %s677_s19, %s670_s20 }
  0x46   : > { %p674_p3 = pneg %p673_p9  ;;  %p680_p4 = por %p679_p1, %p678_p7 }
  0x48   : > { %p681_p5 = pnand %p680_p4, %p674_p3 }
  0x4a   : > { %684 = shalt.err (!%p681_p5)
}
  0x4b   : > { %s775_s27 = smov 512   ;;  %s776_s7 = smov 128  }
  0x4c   : > { %s777_s9 = smov 8   ;;  %p1077_p12 = scmp.ne.s32.totalorder %s1071_s26, 0 }
  0x4d   : > { %566 = dma.hbm_to_vmem [thread:$0]  (!%p1076_p8), %s912_s18, 4096, %s919_s22, %s921_s5, %s775_s27, %s776_s7, %s777_s9  }
  0x4e   : > { %198 = sbr.rel (%p1077_p12) target bundleno = 356 (0x164), region = 32  ;;  %p1078_p2 = scmp.ne.s32.totalorder (!%p1077_p12), %s1066_s21, 0 }
  0x55   : > { %738 = dma.done.wait (%p1078_p2), [#allocation3], 256  }
  0x56   : > { %740 = vsyncadd (%p1078_p2), [#allocation3], 4294967040  ;;  %s956_s8 = sand.u32 1, %s755_s13   ;;  %p1079_p8 = scmp.ne.s32.totalorder %s1068_s23, 0 }
  0x57   : > { %s477_s10 = sshll.u32 %s956_s8, 8  ;;  %s205_s30 = scalar_lea.sflag [#allocation6], %s956_s8 }
  0x58   : > { %s960_s20 = scalar_lea.vmem [#allocation5], %s477_s10 }
  0x59   : > { %742 = dma.done.wait (%p1079_p8), %s205_s30, 4096  }
  0x5a   : > { %744 = vsyncadd (%p1079_p8), %s205_s30, 4294963200  ;;  %v255_v0 = vld [vmem:[%s960_s20 + $0x80] sm:$0xff]  ;;  %v256_v1 = vld [vmem:[%s960_s20 + $0x88] sm:$0xff]  ;;  %p234_p6 = scmp.lt.s32.totalorder %s763_s15, 3  ;;  %s478_s23 = sshll.u32 %s956_s8, 3 }
  0x5b   : > { %v239_v2 = vld [vmem:[%s960_s20] sm:$0xff]  ;;  %v519_v3 = vpack.c.bf16 %v256_v1, %v255_v0  ;;  %v240_v4 = vld [vmem:[%s960_s20 + $0x8] sm:$0xff]  ;;  %v257_v5 = vld [vmem:[%s960_s20 + $0x90] sm:$0xff]  ;;  %s481_s22 = sshll.u32 %s763_s15, 7  ;;  %s233_s5 = scalar_lea.vmem [#allocation7], %s478_s23 }
  0x5c   : > { %v258_v6 = vld [vmem:[%s960_s20 + $0x98] sm:$0xff]  ;;  %v521_v7 = vpack.c.bf16 %v240_v4, %v239_v2  ;;  %v241_v9 = vld [vmem:[%s960_s20 + $0x10] sm:$0xff]  ;;  %v259_v11 = vld [vmem:[%s960_s20 + $0xa0] sm:$0xff]  ;;  %s235_s21 = scalar_select %p234_p6, %s763_s15, 3 }
  0x5d   : > { %v523_v8 = vpack.c.bf16 %v258_v6, %v257_v5  ;;  %v242_v10 = vld [vmem:[%s960_s20 + $0x18] sm:$0xff]  ;;  %520 = vmatprep.subr.bf16.mxu0 %v519_v3  ;;  %v260_v12 = vld [vmem:[%s960_s20 + $0xa8] sm:$0xff]  ;;  %v243_v15 = vld [vmem:[%s960_s20 + $0x20] sm:$0xff]  ;;  %s365_s6 = sshll.u32 %s233_s5, 4  ;;  %s1008_s27 = scalar_lea.hbm %s1059_s3, %s481_s22  ;;  %s1010_s6 = int_to_ptr.vmem [resolvable:$true] %s365_s6 }
  0x5e   : > { %522 = vmatpush3.bf16.msra.mxu0 %v521_v7  ;;  %v525_v13 = vpack.c.bf16 %v242_v10, %v241_v9  ;;  %v527_v14 = vpack.c.bf16 %v260_v12, %v259_v11  ;;  %v244_v16 = vld [vmem:[%s960_s20 + $0x28] sm:$0xff]  ;;  %v261_v17 = vld [vmem:[%s960_s20 + $0xb0] sm:$0xff]  ;;  %v262_v18 = vld [vmem:[%s960_s20 + $0xb8] sm:$0xff]  ;;  %s236_s18 = scalar_lea.vmem %s1058_s2, %s235_s21  ;;  %s350_s7 = scalar_lea.sflag [#allocation4], %s956_s8 }
  0x5f   : > { %524 = vmatprep.subr.bf16.mxu0 %v523_v8  ;;  %v529_v19 = vpack.c.bf16 %v244_v16, %v243_v15  ;;  %v531_v20 = vpack.c.bf16 %v262_v18, %v261_v17  ;;  %v245_v21 = vld [vmem:[%s960_s20 + $0x30] sm:$0xff]  ;;  %v246_v22 = vld [vmem:[%s960_s20 + $0x38] sm:$0xff]  ;;  %v263_v23 = vld [vmem:[%s960_s20 + $0xc0] sm:$0xff]  ;;  %s685_s9 = scalar_lea.vmem %s1010_s6, 128  ;;  %p1080_p11 = scmp.ne.s32.totalorder %s1069_s24, 0 }
  0x60   : > { %v264_v24 = vld [vmem:[%s960_s20 + $0xc8] sm:$0xff]  ;;  %v238_v25 = vld [vmem:[#allocation2 + $0x8] sm:$0xff]  ;;  %v533_v26 = vpack.c.bf16 %v246_v22, %v245_v21  ;;  %v247_v28 = vld [vmem:[%s960_s20 + $0x40] sm:$0xff]  ;;  %p686_p10 = scmp.ne.s32.totalorder %s1010_s6, %s685_s9  ;;  %s778_s15 = smov [#allocation7]  }
  0x61   : > { %342 = vmatprep.mubr.f32.mxu0 %v238_v25  ;;  %v535_v27 = vpack.c.bf16 %v264_v24, %v263_v23  ;;  %v248_v29 = vld [vmem:[%s960_s20 + $0x48] sm:$0xff]  ;;  %v265_v30 = vld [vmem:[%s960_s20 + $0xd0] sm:$0xff]  ;;  %v266_v31 = vld [vmem:[%s960_s20 + $0xd8] sm:$0xff]  ;;  %s689_s10 = sshll.u32 %s778_s15, 4  ;;  %s690_s10 = int_to_ptr.vmem [resolvable:$false] %s689_s10 }
  0x62   : > { %526 = vmatpush3.bf16.msra.mxu0 %v525_v13  ;;  %v537_v32 = vpack.c.bf16 %v248_v29, %v247_v28  ;;  %v539_v33 = vpack.c.bf16 %v266_v31, %v265_v30  ;;  %v249_v34 = vld [vmem:[%s960_s20 + $0x50] sm:$0xff]  ;;  %v250_v35 = vld [vmem:[%s960_s20 + $0x58] sm:$0xff]  ;;  %v267_v36 = vld [vmem:[%s960_s20 + $0xe0] sm:$0xff]  ;;  %p687_p13 = pnand %p686_p10, %p1080_p11  ;;  %s691_s30 = scalar_lea.vmem %s690_s10, 256 }
  0x63   : > { %528 = vmatprep.subr.bf16.mxu0 %v527_v14  ;;  %v268_v37 = vld [vmem:[%s960_s20 + $0xe8] sm:$0xff]  ;;  %v541_v38 = vpack.c.bf16 %v250_v35, %v249_v34  ;;  %v251_v40 = vld [vmem:[%s960_s20 + $0x60] sm:$0xff]  ;;  %v269_v42 = vld [vmem:[%s960_s20 + $0xf0] sm:$0xff]  ;;  %p692_p9 = scmp.lt.s32.totalorder %s1010_s6, %s690_s10  ;;  %p693_p3 = scmp.lt.s32.totalorder %s691_s30, %s685_s9 }
  0x64   : > { %v543_v39 = vpack.c.bf16 %v268_v37, %v267_v36  ;;  %v252_v41 = vld [vmem:[%s960_s20 + $0x68] sm:$0xff]  ;;  %v270_v43 = vld [vmem:[%s960_s20 + $0xf8] sm:$0xff]  ;;  %v253_v46 = vld [vmem:[%s960_s20 + $0x70] sm:$0xff]  ;;  %p688_p0 = pneg %p687_p13 }
  0x65   : > { %v545_v44 = vpack.c.bf16 %v252_v41, %v251_v40  ;;  %v547_v45 = vpack.c.bf16 %v270_v43, %v269_v42  ;;  %v254_v47 = vld [vmem:[%s960_s20 + $0x78] sm:$0xff]  ;;  %v237_v49 = vld [vmem:[#allocation2] sm:$0xff]  ;;  %p694_p7 = por %p693_p3, %p692_p9 }
  0x66   : > { %530 = vmatpush3.bf16.msra.mxu0 %v529_v19  ;;  %v549_v48 = vpack.c.bf16 %v254_v47, %v253_v46  ;;  %v479_v51 = vld [vmem:[%s236_s18] ss:$0 sm:$0xff] }
  0x67   : > { %532 = vmatprep.subr.bf16.mxu0 %v531_v20  ;;  %p695_p1 = pnand %p694_p7, %p688_p0 }
  0x6a   : > { %534 = vmatpush3.bf16.msra.mxu0 %v533_v26 }
  0x6b   : > { %536 = vmatprep.subr.bf16.mxu0 %v535_v27 }
  0x6e   : > { %538 = vmatpush3.bf16.msra.mxu0 %v537_v32 }
  0x6f   : > { %540 = vmatprep.subr.bf16.mxu0 %v539_v33 }
  0x72   : > { %542 = vmatpush3.bf16.msra.mxu0 %v541_v38 }
  0x73   : > { %544 = vmatprep.subr.bf16.mxu0 %v543_v39 }
  0x76   : > { %546 = vmatpush3.bf16.msra.mxu0 %v545_v44 }
  0x77   : > { %548 = vmatprep.subr.bf16.mxu0 %v547_v45 }
  0x7a   : > { %550 = vmatpush3.bf16.msra.mxu0 %v549_v48 }
  0x7d   : > { %343 = vmatmul.mubr.f32.vlgmr.msra.gmra.mrb[0].mxu0 %v237_v49 }
 0x150   : > { %v516_v50 = vpop.f32.mrb[0].mxu0 }
 0x151   : > { %v517_v52 = vpop.f32.mrb[1].mxu0 }
 0x152   : > { %v518_v53 = vadd.f32 %v517_v52, %v516_v50 }
 0x154   : > { %v345_v54 = vadd.f32 %v518_v53, %v479_v51 }
 0x156   : > { %348 = vst [vmem:[%s233_s5] sm:$0xff] %v345_v54 }
 0x157   : > { %698 = shalt.err (!%p695_p1)
}
 0x158   : > { %s699_s8 = scalar_lea.hbm %s1008_s27, 128  ;;  %s703_s23 = scalar_lea.hbm %s1059_s3, 512 }
 0x159   : > { %p700_p4 = scmp.ne.s32.totalorder %s1008_s27, %s699_s8  ;;  %p704_p2 = scmp.lt.u32.totalorder %s1008_s27, %s1059_s3 }
 0x15a   : > { %p705_p8 = scmp.lt.u32.totalorder %s703_s23, %s699_s8  ;;  %p707_p10 = scmp.lt.u32.totalorder %s699_s8, %s1008_s27 }
 0x15b   : > { %p701_p5 = pnand %p700_p4, %p1080_p11 }
 0x15c   : > { %p706_p6 = por %p705_p8, %p704_p2 }
 0x15d   : > { %p702_p12 = pneg %p701_p5 }
 0x15e   : > { %p708_p13 = por %p707_p10, %p706_p6 }
 0x160   : > { %p709_p0 = pnand %p708_p13, %p702_p12 }
 0x162   : > { %712 = shalt.err (!%p709_p0)
}
 0x163   : > { %557 = dma.vmem_to_hbm [thread:$0]  (%p1080_p11), %s1010_s6, 128, %s1008_s27, %s350_s7  }
 0x164 PF: > { %p574_p9 = scmp.ge.s32.totalorder %s771_s17, 2  ;;  %s377_s18 = sand.u32 1, %s751_s12  }
 0x165   : > { %p1081_p3 = scmp.ne.s32.totalorder %s1070_s25, 0  ;;  %s378_s22 = scalar_lea.sflag [#allocation4], %s377_s18 }
 0x167   : > { %p568_p7 = pnand %p574_p9, %p1081_p3 }
 0x169   : > { %746 = dma.done.wait (!%p568_p7), %s378_s22, 128  }
 0x16a   : > { %748 = vsyncadd (!%p568_p7), %s378_s22, 4294967168  ;;  %s20_s17 = sadd.s32 1, %s771_s17   ;;  %s1082_s12 = smov %s755_s13 }
 0x16b   : > { %p17_p1 = scmp.ge.s32.totalorder %s20_s17, 6   ;;  %s1083_s13 = smov %s759_s14 }
 0x16c   : > { %s1084_s14 = smov %s917_s28  ;;  %s1085_s15 = smov %s767_s16 }
 0x16d   : > { %s1086_s16 = smov %s1088_s4  ;;  %19 = sbr.rel (!%p17_p1) target bundleno = 7 (0x7), region = 86 }
 0x174   :  { %383 = vsyncpa [#allocation3], 1 }
 0x175   :  { %385 = vsyncpa [#allocation3 + $0x1], 1 }
 0x176   :  { %386 = vsyncpa [#allocation6], 1 }
 0x177   :  { %388 = vsyncpa [#allocation6 + $0x1], 1 }
 0x178   :  { %389 = vsyncpa [#allocation4], 1 }
 0x179   :  { %391 = vsyncpa [#allocation4 + $0x1], 1 }

</bundles_post_ra>
